<compile_context>
chip_gen: v7x
topology: tpu7x:2x2x1
jax: 0.10.0
libtpu: 0.0.40
codegen_flags: <defaults>
</compile_context>

<pallas_src>
import functools

import jax
import jax.numpy as jnp
from jax.experimental import pallas as pl
from jax.experimental.pallas import tpu as pltpu


def _ohem_ce_kernel(score_ref, tgt_ref, out_ref, *, ignore_label, hw):
    """score_ref: (C, T); tgt_ref: (1, T) int32; out_ref: (2, T) f32."""
    s = score_ref[...].astype(jnp.float32)                      # (C, T)
    t = tgt_ref[...]                                            # (1, T)
    T = s.shape[1]

    # Tail lanes of the last (partial) block are treated as ignored pixels.
    lane = jax.lax.broadcasted_iota(jnp.int32, (1, T), 1)
    in_bounds = (pl.program_id(1) * T + lane) < hw
    valid = (t != ignore_label) & in_bounds                     # (1, T)
    t_safe = jnp.where(valid, t, 0)                             # ignored -> class 0

    c_iota = jax.lax.broadcasted_iota(jnp.int32, s.shape, 0)    # (C, T)
    onehot = c_iota == t_safe

    # Softmax stats over the class (sublane) axis: pure VPU/EUP work.
    m = jnp.max(s, axis=0, keepdims=True)                       # (1, T)
    e = jnp.exp(s - m)                                          # (C, T)
    denom = jnp.sum(e, axis=0, keepdims=True)                   # (1, T)
    true_logit = jnp.sum(jnp.where(onehot, s, 0.0), axis=0, keepdims=True)

    logsumexp = jnp.log(denom) + m                              # (1, T)
    loss_raw = logsumexp - true_logit                           # (1, T)

    # Row 0: CE loss (0 on ignored/tail pixels).  Row 1: softmax prob of the
    # true class; ignored/tail lanes get a sentinel (never selected downstream).
    out_ref[0:1, :] = jnp.where(valid, loss_raw, 0.0)
    out_ref[1:2, :] = jnp.where(valid, jnp.exp(-loss_raw), 2.0)


def _per_pixel_ce_and_prob(score_nc_hw, target_n1_hw, ignore_label, tile):
    """score: (N, C, HW); target: (N, 1, HW) int32 -> (N, 2, HW) f32."""
    N, C, HW = score_nc_hw.shape
    kernel = functools.partial(_ohem_ce_kernel, ignore_label=ignore_label, hw=HW)
    return pl.pallas_call(
        kernel,
        out_shape=jax.ShapeDtypeStruct((N, 2, HW), jnp.float32),
        grid_spec=pltpu.PrefetchScalarGridSpec(
            num_scalar_prefetch=0,
            grid=(N, pl.cdiv(HW, tile)),
            in_specs=[
                pl.BlockSpec((None, C, tile), lambda n, i: (n, 0, i)),
                pl.BlockSpec((None, 1, tile), lambda n, i: (n, 0, i)),
            ],
            out_specs=pl.BlockSpec((None, 2, tile), lambda n, i: (n, 0, i)),
        ),
        compiler_params=pltpu.CompilerParams(
            dimension_semantics=("parallel", "parallel"),
            vmem_limit_bytes=32 * 1024 * 1024),
    )(score_nc_hw, target_n1_hw)


def ohem_cross_entropy(score, target, ignore_label=-1, thresh=0.7,
                       min_kept=100000, tile=None):
    """Matches OhemCrossEntropy.forward(score, target) (weights=[1] => _ohem_forward)."""
    min_kept = max(1, int(min_kept))
    N, C, H, W = score.shape
    assert target.shape == (N, H, W)
    # TODO(synk): bilinear F.interpolate(align_corners=True) resize path (when
    # score spatial dims != target dims) and per-class weights are not
    # implemented; shapes must match and weight must be None.

    HW = H * W
    score_r = score.reshape(N, C, HW)                # free in NCHW layout; bf16 OK
    target_r = target.reshape(N, 1, HW).astype(jnp.int32)

    if tile is None:
        # ~2 MiB of score per block; cap at 32K lanes for v5e/v7x VMEM headroom.
        tile = min((2 * 1024 * 1024) // max(1, C * 4), 32768)
    tile = max(128, (int(tile) // 128) * 128)
    tile = min(tile, ((HW + 127) // 128) * 128)      # don't exceed spatial extent

    out = _per_pixel_ce_and_prob(score_r, target_r, ignore_label, tile)
    loss = out[:, 0, :].reshape(-1)                  # (P,)
    pred = out[:, 1, :].reshape(-1)                  # (P,)
    target_flat = target.reshape(-1).astype(jnp.int32)

    mask = target_flat != ignore_label
    n_valid = jnp.sum(mask)
    thresh_f = jnp.asarray(thresh, dtype=jnp.float32)

    idx = jnp.maximum(jnp.int32(0),
                      jnp.minimum(jnp.int32(min_kept), n_valid - 1))
    k_needed = idx + 1                               # rank (1-based) of the k-th smallest

    # Short-circuit: if at least k_needed valid pixels have pred <= thresh, the
    # k-th smallest prob is <= thresh and the final threshold is exactly thresh.
    count_easy = jnp.sum(mask & (pred <= thresh_f))

    pred_bits = jax.lax.bitcast_convert_type(pred, jnp.int32)
    upper_bits = jax.lax.bitcast_convert_type(jnp.float32(4.0), jnp.int32)

    def _kth_smallest(_):
        # Exact k-th smallest valid prob via binary search on the monotone
        # float32 bit pattern (probs are >= 0): 32 masked counting passes.
        def body(_, lh):
            lo, hi = lh
            mid = lo + (hi - lo) // 2
            c = jnp.sum(mask & (pred_bits <= mid))
            ge = c >= k_needed
            return (jnp.where(ge, lo, mid + 1), jnp.where(ge, mid, hi))
        _, hi = jax.lax.fori_loop(0, 32, body,
                                  (jnp.zeros((), jnp.int32), upper_bits))
        return jax.lax.bitcast_convert_type(hi, jnp.float32)

    min_value = jax.lax.cond(count_easy >= k_needed,
                             lambda _: thresh_f, _kth_smallest, None)
    threshold = jnp.maximum(min_value, thresh_f)

    keep = mask & (pred < threshold)                 # strict <, as in PyTorch
    keep_f = keep.astype(jnp.float32)
    # Matches PyTorch semantics: empty selection yields NaN (mean of empty).
    return jnp.sum(loss * keep_f) / jnp.sum(keep_f)


if __name__ == "__main__":
    key = jax.random.PRNGKey(0)
    k1, k2 = jax.random.split(key)

    N, C, H, W = 2, 4, 16, 16
    score = jax.random.normal(k1, (N, C, H, W), dtype=jnp.float32)
    # labels in [-1, C): -1 is the ignore label
    target = jax.random.randint(k2, (N, H, W), minval=-1, maxval=C, dtype=jnp.int32)

    out = ohem_cross_entropy(score, target, ignore_label=-1, thresh=0.7,
                             min_kept=100000)
    jax.block_until_ready(out)
    print("KERNEL_OK")
</pallas_src>

<mosaic_0001>
module attributes {stable_mosaic.version = 11 : i64} {
  func.func @_ohem_ce_kernel(%arg0: i32, %arg1: i32, %arg2: memref<1x4x256xf32, #tpu.memory_space<vmem>>, %arg3: memref<1x1x256xi32, #tpu.memory_space<vmem>>, %arg4: memref<1x2x256xf32, #tpu.memory_space<vmem>>) attributes {dimension_semantics = [#tpu.dimension_semantics<parallel>, #tpu.dimension_semantics<parallel>], iteration_bounds = array<i64: 2, 1>, scalar_prefetch = 0 : i64, scratch_operands = 0 : i64, tpu.core_type = #tpu.core_type<tc>, window_params = [{transform_indices = @transform_0, window_bounds = array<i64: 1, 4, 256>}, {transform_indices = @transform_1, window_bounds = array<i64: 1, 1, 256>}, {transform_indices = @transform_2, window_bounds = array<i64: 1, 2, 256>}]} {
    %c0 = arith.constant 0 : index
    %c0_0 = arith.constant 0 : index
    %c0_1 = arith.constant 0 : index
    %0 = vector.load %arg2[%c0, %c0_0, %c0_1] : memref<1x4x256xf32, #tpu.memory_space<vmem>>, vector<1x4x256xf32>
    %1 = vector.shape_cast %0 : vector<1x4x256xf32> to vector<4x256xf32>
    %c0_2 = arith.constant 0 : index
    %c0_3 = arith.constant 0 : index
    %c0_4 = arith.constant 0 : index
    %2 = vector.load %arg3[%c0_2, %c0_3, %c0_4] : memref<1x1x256xi32, #tpu.memory_space<vmem>>, vector<1x1x256xi32>
    %3 = vector.shape_cast %2 : vector<1x1x256xi32> to vector<1x256xi32>
    %4 = tpu.iota {dimensions = array<i32: 1>} : vector<1x256xi32>
    %c256_i32 = arith.constant 256 : i32
    %5 = arith.muli %arg1, %c256_i32 : i32
    %6 = vector.broadcast %5 : i32 to vector<1x256xi32>
    %7 = arith.addi %6, %4 : vector<1x256xi32>
    %c256_i32_5 = arith.constant 256 : i32
    %8 = vector.broadcast %c256_i32_5 : i32 to vector<1x256xi32>
    %9 = arith.cmpi slt, %7, %8 : vector<1x256xi32>
    %c-1_i32 = arith.constant -1 : i32
    %10 = vector.broadcast %c-1_i32 : i32 to vector<1x256xi32>
    %11 = arith.cmpi ne, %3, %10 : vector<1x256xi32>
    %12 = arith.andi %11, %9 : vector<1x256xi1>
    %c0_i32 = arith.constant 0 : i32
    %13 = vector.broadcast %c0_i32 : i32 to vector<1x256xi32>
    %14 = arith.select %12, %3, %13 : vector<1x256xi1>, vector<1x256xi32>
    %15 = tpu.iota {dimensions = array<i32: 0>} : vector<4x256xi32>
    %16 = vector.broadcast %14 : vector<1x256xi32> to vector<4x256xi32>
    %17 = arith.cmpi eq, %15, %16 : vector<4x256xi32>
    %cst = arith.constant dense<0xFF800000> : vector<256xf32>
    %18 = vector.multi_reduction <maximumf>, %1, %cst [0] : vector<4x256xf32> to vector<256xf32>
    %19 = vector.shape_cast %18 : vector<256xf32> to vector<1x256xf32>
    %20 = vector.broadcast %19 : vector<1x256xf32> to vector<4x256xf32>
    %21 = arith.subf %1, %20 : vector<4x256xf32>
    %22 = math.exp %21 : vector<4x256xf32>
    %cst_6 = arith.constant dense<0.000000e+00> : vector<256xf32>
    %23 = vector.multi_reduction <add>, %22, %cst_6 [0] : vector<4x256xf32> to vector<256xf32>
    %24 = vector.shape_cast %23 : vector<256xf32> to vector<1x256xf32>
    %cst_7 = arith.constant 0.000000e+00 : f32
    %25 = vector.broadcast %cst_7 : f32 to vector<4x256xf32>
    %26 = arith.select %17, %1, %25 : vector<4x256xi1>, vector<4x256xf32>
    %cst_8 = arith.constant dense<0.000000e+00> : vector<256xf32>
    %27 = vector.multi_reduction <add>, %26, %cst_8 [0] : vector<4x256xf32> to vector<256xf32>
    %28 = vector.shape_cast %27 : vector<256xf32> to vector<1x256xf32>
    %29 = math.log %24 : vector<1x256xf32>
    %30 = arith.addf %29, %19 : vector<1x256xf32>
    %31 = arith.subf %30, %28 : vector<1x256xf32>
    %cst_9 = arith.constant 0.000000e+00 : f32
    %32 = vector.broadcast %cst_9 : f32 to vector<1x256xf32>
    %33 = arith.select %12, %31, %32 : vector<1x256xi1>, vector<1x256xf32>
    %c0_10 = arith.constant 0 : index
    %c0_11 = arith.constant 0 : index
    %c0_12 = arith.constant 0 : index
    %34 = vector.load %arg4[%c0_10, %c0_11, %c0_12] : memref<1x2x256xf32, #tpu.memory_space<vmem>>, vector<1x1x256xf32>
    %35 = vector.shape_cast %34 : vector<1x1x256xf32> to vector<1x256xf32>
    %36 = vector.shape_cast %33 : vector<1x256xf32> to vector<1x1x256xf32>
    tpu.vector_store %arg4[%c0_10, %c0_11, %c0_12], %36 {strides = array<i32>} : memref<1x2x256xf32, #tpu.memory_space<vmem>>, vector<1x1x256xf32>,
    %cst_13 = arith.constant 0.000000e+00 : f32
    %37 = vector.broadcast %cst_13 : f32 to vector<1x256xf32>
    %38 = arith.subf %37, %31 : vector<1x256xf32>
    %39 = math.exp %38 : vector<1x256xf32>
    %cst_14 = arith.constant 2.000000e+00 : f32
    %40 = vector.broadcast %cst_14 : f32 to vector<1x256xf32>
    %41 = arith.select %12, %39, %40 : vector<1x256xi1>, vector<1x256xf32>
    %c0_15 = arith.constant 0 : index
    %c1 = arith.constant 1 : index
    %c0_16 = arith.constant 0 : index
    %42 = vector.load %arg4[%c0_15, %c1, %c0_16] : memref<1x2x256xf32, #tpu.memory_space<vmem>>, vector<1x1x256xf32>
    %43 = vector.shape_cast %42 : vector<1x1x256xf32> to vector<1x256xf32>
    %44 = vector.shape_cast %41 : vector<1x256xf32> to vector<1x1x256xf32>
    tpu.vector_store %arg4[%c0_15, %c1, %c0_16], %44 {strides = array<i32>} : memref<1x2x256xf32, #tpu.memory_space<vmem>>, vector<1x1x256xf32>,
    return
  }
  func.func @transform_0(%arg0: i32, %arg1: i32) -> (i32, i32, i32) {
    %c0_i32 = arith.constant 0 : i32
    %c0_i32_0 = arith.constant 0 : i32
    return %arg0, %c0_i32, %arg1 : i32, i32, i32
  }
  func.func @transform_1(%arg0: i32, %arg1: i32) -> (i32, i32, i32) {
    %c0_i32 = arith.constant 0 : i32
    %c0_i32_0 = arith.constant 0 : i32
    return %arg0, %c0_i32, %arg1 : i32, i32, i32
  }
  func.func @transform_2(%arg0: i32, %arg1: i32) -> (i32, i32, i32) {
    %c0_i32 = arith.constant 0 : i32
    %c0_i32_0 = arith.constant 0 : i32
    return %arg0, %c0_i32, %arg1 : i32, i32, i32
  }
}

</mosaic_0001>

<bundles_post_ra>
// kernel: tpu_custom_call.1
= control target key start
LH: loop header
LB: loop body
LE: loop exit
PB: predicated region body
PF: predicated region fallthrough
CT: control target
= control target key end

     0   :  { %7 = vsyncpa [#allocation3], 0  ;;  %s1024_s0 = inlined_call_operand.hbm [shape: f32[2,4,256], index: 0, kind: input, shape index: {}]   ;;  %s1025_s1 = inlined_call_operand.hbm [shape: s32[2,1,256], index: 1, kind: input, shape index: {}]   ;;  %s1026_s2 = inlined_call_operand.hbm [shape: f32[2,2,256], index: 2, kind: output, shape index: {}]  }
   0x1   :  { %9 = vsyncpa [#allocation3 + $0x1], 0 }
   0x2   :  { %10 = vsyncpa [#allocation6], 0 }
   0x3   :  { %12 = vsyncpa [#allocation6 + $0x1], 0 }
   0x4   :  { %13 = vsyncpa [#allocation4], 0 }
   0x5   :  { %15 = vsyncpa [#allocation4 + $0x1], 0  ;;  %s782_s9 = smov 0   ;;  %s784_s10 = smov 0  }
   0x6   :  { %s786_s11 = smov 0   ;;  %s788_s12 = smov 0  }
   0x7   :  { %s790_s13 = smov 0   ;;  %s792_s14 = smov 0  }
   0x8 LB: > { %s511_s15 = sadd.s32 4294967295, %s760_s14   ;;  %s512_s16 = sadd.s32 4294967294, %s760_s14   ;;  %s760_s14 = sphi %s792_s14, %s21_s14   ;;  %s756_s13 = sphi %s790_s13, %s1048_s13   ;;  %s752_s12 = sphi %s788_s12, %s1047_s12   ;;  %s748_s11 = sphi %s786_s11, %s1046_s11   ;;  %s744_s10 = sphi %s784_s10, %s1045_s10   ;;  %s740_s9 = sphi %s782_s9, %s1044_s9  }
   0x9   : > { %s33_s17 = sadd.s32 1, %s756_s13  ;;  %s42_s18 = sadd.s32 1, %s748_s11 }
   0xa   : > { %p35_p0 = scmp.ge.s32.totalorder %s33_s17, 2  ;;  %p49_p1 = scmp.ne.s32.totalorder %s748_s11, %s744_s10 }
   0xb   : > { %p50_p2 = scmp.eq.s32.totalorder %s760_s14, 0  ;;  %p55_p3 = scmp.ne.s32.totalorder %s744_s10, %s740_s9 }
   0xc   : > { %s1050_s17 = smov (%p35_p0, %s33_s17), 0  ;;  %p56_p5 = scmp.eq.s32.totalorder %s511_s15, 0 }
   0xd   : > { %p823_p4 = por %p50_p2, %p49_p1  ;;  %s37_s20 = ssub.s32 %s756_s13, %s1050_s17 }
   0xe   : > { %p109_p6 = scmp.eq.s32.totalorder %s511_s15, 1  ;;  %p40_p7 = scmp.eq.s32.totalorder %s37_s20, 0 }
   0xf   : > { %p829_p8 = por %p56_p5, %p55_p3  ;;  %p115_p10 = scmp.eq.s32.totalorder %s512_s16, 1 }
  0x10   : > { %p833_p9 = por %p109_p6, %p49_p1  ;;  %p551_p13 = scmp.lt.s32.totalorder %s760_s14, 2 }
  0x11   : > { %s1030_s21 = scalar_select %p829_p8, 1, 0 }
  0x12   : > { %s1031_s22 = scalar_select %p833_p9, 1, 0 }
  0x13   : > { %s838_s23 = scalar_select %p40_p7, %s748_s11, %s42_s18  }
  0x14   : > { %p840_p11 = por %p115_p10, %p55_p3  ;;  %s847_s25 = sand.u32 1, %s748_s11  }
  0x15   : > { %s515_s26 = sshll.u32 %s847_s25, 3  ;;  %s531_s27 = sshll.u32 %s756_s13, 7 }
  0x16   : > { %s1032_s24 = scalar_select %p840_p11, 1, 0 }
  0x17   : > { %s854_s30 = scalar_lea.hbm %s1024_s0, %s531_s27  ;;  %s139_s3 = scalar_lea.vmem [#allocation2], %s515_s26 }
  0x18   : > { %s149_s4 = sshll.u32 %s139_s3, 4  ;;  %p860_p0 = pnand %p551_p13, %p823_p4  ;;  %s856_s4 = int_to_ptr.vmem [resolvable:$true] %s149_s4 }
  0x19   : > { %s136_s6 = scalar_lea.sflag [#allocation3], %s847_s25  ;;  %s614_s7 = scalar_lea.hbm %s854_s30, 128 }
  0x1a   : > { %p615_p3 = scmp.ne.s32.totalorder %s854_s30, %s614_s7  ;;  %p616_p5 = pneg %p860_p0 }
  0x1b   : > { %s619_s16 = scalar_lea.hbm %s1024_s0, 256  ;;  %p620_p4 = scmp.lt.u32.totalorder %s854_s30, %s1024_s0 }
  0x1c   : > { %p617_p6 = pnand %p616_p5, %p615_p3  ;;  %p621_p10 = scmp.lt.u32.totalorder %s619_s16, %s614_s7 }
  0x1d   : > { %p623_p12 = scmp.lt.u32.totalorder %s614_s7, %s854_s30 }
  0x1e   : > { %p618_p7 = pneg %p617_p6  ;;  %p622_p13 = por %p621_p10, %p620_p4 }
  0x20   : > { %p624_p1 = por %p623_p12, %p622_p13 }
  0x22   : > { %p625_p2 = pnand %p624_p1, %p618_p7 }
  0x24   : > { %628 = shalt.err (!%p625_p2)
}
  0x25   : > { %s629_s20 = scalar_lea.vmem %s856_s4, 128  ;;  %s762_s26 = smov [#allocation2]  }
  0x26   : > { %p630_p3 = scmp.ne.s32.totalorder %s856_s4, %s629_s20  ;;  %s634_s27 = sshll.u32 %s762_s26, 4  ;;  %s635_s27 = int_to_ptr.vmem [resolvable:$false] %s634_s27 }
  0x27   : > { %s636_s28 = scalar_lea.vmem %s635_s27, 256  ;;  %p637_p9 = scmp.lt.s32.totalorder %s856_s4, %s635_s27 }
  0x28   : > { %p632_p6 = pnand %p630_p3, %p616_p5  ;;  %p638_p4 = scmp.lt.s32.totalorder %s636_s28, %s629_s20 }
  0x2a   : > { %p633_p11 = pneg %p632_p6  ;;  %p639_p10 = por %p638_p4, %p637_p9 }
  0x2c   : > { %p640_p12 = pnand %p639_p10, %p633_p11 }
  0x2e   : > { %643 = shalt.err (!%p640_p12)
}
  0x2f   : > { %543 = dma.hbm_to_vmem [thread:$0]  (!%p860_p0), %s854_s30, 128, %s856_s4, %s136_s6  }
  0x30   : > { %p1034_p1 = scmp.lt.s32.totalorder %s760_s14, 3  ;;  %p1035_p2 = scmp.ge.s32.totalorder %s760_s14, 1 }
  0x31   : > { %s518_s3 = sshll.u32 %s847_s25, 1  ;;  %s532_s7 = sshll.u32 %s756_s13, 5 }
  0x32   : > { %p896_p7 = pnand %p1035_p2, %p1034_p1  ;;  %s905_s16 = scalar_lea.hbm %s1025_s1, %s532_s7 }
  0x33   : > { %s160_s18 = scalar_lea.vmem [#allocation5], %s518_s3  ;;  %s157_s30 = scalar_lea.sflag [#allocation6], %s847_s25 }
  0x34   : > { %s1036_s29 = scalar_select %p896_p7, 1, 0 }
  0x35   : > { %s170_s19 = sshll.u32 %s160_s18, 4  ;;  %s644_s4 = scalar_lea.hbm %s905_s16, 32  ;;  %s171_s19 = int_to_ptr.vmem [resolvable:$true] %s170_s19 }
  0x36   : > { %p645_p9 = scmp.ne.s32.totalorder %s905_s16, %s644_s4  ;;  %s649_s26 = scalar_lea.hbm %s1025_s1, 64 }
  0x37   : > { %p650_p3 = scmp.lt.u32.totalorder %s905_s16, %s1025_s1  ;;  %p651_p6 = scmp.lt.u32.totalorder %s649_s26, %s644_s4 }
  0x38   : > { %p647_p11 = pnand %p645_p9, %p616_p5  ;;  %p653_p10 = scmp.lt.u32.totalorder %s644_s4, %s905_s16 }
  0x39   : > { %p652_p4 = por %p651_p6, %p650_p3 }
  0x3a   : > { %p648_p13 = pneg %p647_p11 }
  0x3b   : > { %p654_p12 = por %p653_p10, %p652_p4 }
  0x3d   : > { %p655_p1 = pnand %p654_p12, %p648_p13 }
  0x3f   : > { %658 = shalt.err (!%p655_p1)
}
  0x40   : > { %s659_s25 = scalar_lea.vmem %s171_s19, 32  ;;  %s763_s3 = smov [#allocation5]  }
  0x41   : > { %p660_p2 = scmp.ne.s32.totalorder %s171_s19, %s659_s25  ;;  %s664_s7 = sshll.u32 %s763_s3, 4  ;;  %s665_s7 = int_to_ptr.vmem [resolvable:$false] %s664_s7 }
  0x42   : > { %s666_s8 = scalar_lea.vmem %s665_s7, 64  ;;  %p667_p8 = scmp.lt.s32.totalorder %s171_s19, %s665_s7 }
  0x43   : > { %p662_p9 = pnand %p660_p2, %p616_p5  ;;  %p668_p7 = scmp.lt.s32.totalorder %s666_s8, %s659_s25 }
  0x45   : > { %p663_p11 = pneg %p662_p9  ;;  %p669_p3 = por %p668_p7, %p667_p8 }
  0x47   : > { %p670_p6 = pnand %p669_p3, %p663_p11 }
  0x49   : > { %673 = shalt.err (!%p670_p6)
}
  0x4a   : > { %546 = dma.hbm_to_vmem [thread:$0]  (!%p860_p0), %s905_s16, 32, %s171_s19, %s157_s30  }
  0x4b   : > { %p1037_p13 = scmp.ne.s32.totalorder %s1036_s29, 0 }
  0x4c   : > { %s930_s15 = sand.u32 (!%p1037_p13), 1, %s744_s10   ;;  %p1038_p5 = scmp.ne.s32.totalorder (!%p1037_p13), %s1030_s21, 0 }
  0x4d   : > { %179 = sbr.rel (%p1037_p13) target bundleno = 189 (0xbd), region = 28  ;;  %s522_s18 = sshll.u32 (!%p1037_p13), %s930_s15, 3 }
  0x4e   : > { %s182_s4 = scalar_lea.sflag (!%p1037_p13), [#allocation3], %s930_s15  ;;  %s185_s6 = scalar_lea.vmem (!%p1037_p13), [#allocation2], %s522_s18 }
  0x54   : > { %727 = dma.done.wait (%p1038_p5), %s182_s4, 128  }
  0x55   : > { %729 = vsyncadd (%p1038_p5), %s182_s4, 4294967168  ;;  %s523_s5 = sshll.u32 %s930_s15, 1  ;;  %s191_s29 = scalar_lea.sflag [#allocation6], %s930_s15 }
  0x56   : > { %s194_s16 = scalar_lea.vmem [#allocation5], %s523_s5 }
  0x57   : > { %731 = dma.done.wait (%p1038_p5), %s191_s29, 32  }
  0x58   : > { %733 = vsyncadd (%p1038_p5), %s191_s29, 4294967264  ;;  %v764_v0 = vmov 1966171168   ;;  %v241_v2 = vlaneseq  ;;  %vm270_vm0 = vcmask 1043456   ;;  %v223_v5 = vld [vmem:[%s185_s6] sm:$0xff]  ;;  %v765_v9 = vmov 1  }
  0x59   : > { %v239_v1 = vunpack.c.l.s4 %v764_v0  ;;  %v268_v6 = vcombine.high %v223_v5, %v223_v5  ;;  %v271_v7 = vsel %vm270_vm0, %v223_v5, -inf  ;;  %v237_v10 = vcombine.low %v765_v9, %v765_v9  ;;  %v224_v23 = vld [vmem:[%s194_s16] sm:$0x3]  ;;  %s524_s21 = sshll.u32 %s930_s15, 2  ;;  %s533_s20 = sshll.u32 %s752_s12, 6 }
  0x5a   : > { %v242_v4 = vshrl.u32 %v241_v2, 7  ;;  %v272_v8 = vrot.slane %v271_v7, 4  ;;  %vm234_vm1 = vcmp.ne.s32.totalorder %v224_v23, 4294967295  ;;  %vm354_vm6 = vcmp.lt.s32.totalorder %v241_v2, 256  ;;  %s219_s19 = scalar_lea.vmem [#allocation7], %s524_s21  ;;  %s975_s28 = scalar_lea.hbm %s1026_s2, %s533_s20 }
  0x5b   : > { %v240_v3 = vunpack.c.0.s8 %v239_v1  ;;  %v278_v12 = vsel %vm270_vm0, %v268_v6, -inf  ;;  %s401_s30 = sshll.u32 %s219_s19, 4  ;;  %s385_s25 = scalar_lea.sflag [#allocation4], %s930_s15  ;;  %s970_s30 = int_to_ptr.vmem [resolvable:$true] %s401_s30 }
  0x5c   : > { %v273_v13 = vmax.f32 %v271_v7, %v272_v8  ;;  %v279_v14 = vrot.slane %v278_v12, 4  ;;  %v259_v30 = vsub.s32 0, %v242_v4  ;;  %v263_v33 = vsub.s32 1, %v242_v4  ;;  %s674_s3 = scalar_lea.vmem %s970_s30, 64  ;;  %p1041_p0 = scmp.ne.s32.totalorder %s1031_s22, 0 }
  0x5d   : > { %v946_v11 = vsub.s32 %v240_v3, %v242_v4  ;;  %p675_p8 = scmp.ne.s32.totalorder %s970_s30, %s674_s3  ;;  %s766_s12 = smov [#allocation7]  }
  0x5e   : > { %v274_v15 = vrot.slane %v273_v13, 2  ;;  %v280_v16 = vmax.f32 %v278_v12, %v279_v14  ;;  %s678_s7 = sshll.u32 %s766_s12, 4  ;;  %s679_s7 = int_to_ptr.vmem [resolvable:$false] %s678_s7 }
  0x5f   : > { %v244_v17 = vrot.slane %v237_v10, %v946_v11  ;;  %p676_p7 = pnand %p675_p8, %p1041_p0  ;;  %s680_s8 = scalar_lea.vmem %s679_s7, 128 }
  0x60   : > { %v275_v18 = vmax.f32 %v273_v13, %v274_v15  ;;  %v281_v19 = vrot.slane %v280_v16, 2  ;;  %p681_p10 = scmp.lt.s32.totalorder %s970_s30, %s679_s7  ;;  %p682_p12 = scmp.lt.s32.totalorder %s680_s8, %s674_s3 }
  0x61   : > { %v251_v22 = vrot.slane %v244_v17, %v946_v11  ;;  %p677_p4 = pneg %p676_p7 }
  0x62   : > { %v276_v20 = vrot.slane %v275_v18, 1  ;;  %v282_v21 = vmax.f32 %v280_v16, %v281_v19  ;;  %p683_p1 = por %p682_p12, %p681_p10 }
  0x63   : > { %vm252_vm2 = vcmp.ne.s32.totalorder %v251_v22, 0 }
  0x64   : > { %v277_v24 = vmax.f32 %v275_v18, %v276_v20  ;;  %v283_v25 = vrot.slane %v282_v21, 1  ;;  %vm951_vm3 = vmand %vm234_vm1, %vm252_vm2  ;;  %p684_p2 = pnand %p683_p1, %p677_p4 }
  0x65   : > { %v254_v32 = vsel %vm951_vm3, %v224_v23, 0 }
  0x66   : > { %v284_v26 = vmax.f32 %v282_v21, %v283_v25  ;;  %v260_v34 = vrot.slane %v254_v32, %v259_v30  ;;  %v264_v35 = vrot.slane %v254_v32, %v263_v33 }
  0x68   : > { %v287_v27 = vcombine.low %v277_v24, %v284_v26  ;;  %vm265_vm4 = vcmp.eq.s32.totalorder %v242_v4, %v260_v34  ;;  %vm266_vm5 = vcmp.eq.s32.totalorder %v242_v4, %v264_v35 }
  0x69   : > { %v309_v36 = vsel %vm265_vm4, %v223_v5, 0.0  ;;  %v310_v40 = vsel %vm266_vm5, %v268_v6, 0.0 }
  0x6a   : > { %v289_v29 = vsub.f32 %v223_v5, %v287_v27  ;;  %v311_v42 = vsel %vm270_vm0, %v309_v36, 0.0  ;;  %v318_v46 = vsel %vm270_vm0, %v310_v40, 0.0 }
  0x6b   : > { %v312_v47 = vrot.slane %v311_v42, 4  ;;  %v319_v50 = vrot.slane %v318_v46, 4 }
  0x6c   : > { %v290_v31 = vmul.f32 1.442695, %v289_v29 }
  0x6d   : > { %v313_v53 = vadd.f32 %v312_v47, %v311_v42  ;;  %v320_v56 = vadd.f32 %v319_v50, %v318_v46 }
  0x6e   : > { %604 = vpow2.f32 %v290_v31 }
  0x6f   : > { %v314_v59 = vrot.slane %v313_v53, 2  ;;  %v321_v61 = vrot.slane %v320_v56, 2 }
  0x71   : > { %v315_v62 = vadd.f32 %v314_v59, %v313_v53  ;;  %v322_v63 = vadd.f32 %v321_v61, %v320_v56 }
  0x73   : > { %v316_v0 = vrot.slane %v315_v62, 1  ;;  %v323_v1 = vrot.slane %v322_v63, 1 }
  0x75   : > { %v317_v4 = vadd.f32 %v316_v0, %v315_v62  ;;  %v324_v7 = vadd.f32 %v323_v1, %v322_v63 }
  0x78   : > { %v605_v37 = vpop.eup %604 }
  0x79   : > { %v293_v38 = vcombine.high %v605_v37, %v605_v37  ;;  %v295_v39 = vsel %vm270_vm0, %v605_v37, 0.0 }
  0x7a   : > { %v296_v41 = vrot.slane %v295_v39, 4 }
  0x7b   : > { %v302_v43 = vsel %vm270_vm0, %v293_v38, 0.0 }
  0x7c   : > { %v297_v44 = vadd.f32 %v296_v41, %v295_v39  ;;  %v303_v45 = vrot.slane %v302_v43, 4 }
  0x7e   : > { %v298_v48 = vrot.slane %v297_v44, 2  ;;  %v304_v49 = vadd.f32 %v303_v45, %v302_v43 }
  0x80   : > { %v299_v51 = vadd.f32 %v298_v48, %v297_v44  ;;  %v305_v52 = vrot.slane %v304_v49, 2 }
  0x82   : > { %v300_v54 = vrot.slane %v299_v51, 1  ;;  %v306_v55 = vadd.f32 %v305_v52, %v304_v49 }
  0x84   : > { %v301_v57 = vadd.f32 %v300_v54, %v299_v51  ;;  %v307_v58 = vrot.slane %v306_v55, 1 }
  0x86   : > { %v308_v60 = vadd.f32 %v307_v58, %v306_v55  ;;  %606 = vlog2.f32 %v301_v57 }
  0x88   : > { %608 = vlog2.f32 %v308_v60 }
  0x90   : > { %v607_v3 = vpop.eup %606 }
  0x91   : > { %v326_v5 = vmul.f32 0.6931472, %v607_v3 }
  0x92   : > { %v609_v6 = vpop.eup %608 }
  0x93   : > { %v328_v8 = vmul.f32 0.6931472, %v609_v6  ;;  %v329_v9 = vadd.f32 %v326_v5, %v277_v24 }
  0x95   : > { %v330_v10 = vadd.f32 %v328_v8, %v284_v26  ;;  %v331_v12 = vsub.f32 %v329_v9, %v317_v4 }
  0x97   : > { %v332_v13 = vsub.f32 %v330_v10, %v324_v7  ;;  %v357_v14 = vsub.f32 0.0, %v331_v12 }
  0x99   : > { %v335_v15 = vcombine.low %v331_v12, %v332_v13  ;;  %v358_v16 = vsub.f32 0.0, %v332_v13  ;;  %v359_v17 = vmul.f32 1.442695, %v357_v14 }
  0x9b   : > { %v342_v18 = vrot.slane %v335_v15, %v946_v11  ;;  %610 = vpow2.f32 %v359_v17  ;;  %v361_v19 = vmul.f32 1.442695, %v358_v16 }
  0x9d   : > { %v349_v20 = vrot.slane %v342_v18, %v946_v11  ;;  %612 = vpow2.f32 %v361_v19 }
  0x9f   : > { %v351_v21 = vsel %vm951_vm3, %v349_v20, 0.0 }
  0xa0   : > { %356 = vst.msk [vmem:[%s219_s19] ss:$2 sm:$0x3] %vm354_vm6, %v351_v21 }
  0xa5   : > { %v611_v22 = vpop.eup %610 }
  0xa7   : > { %v613_v23 = vpop.eup %612 }
  0xa8   : > { %v365_v24 = vcombine.low %v611_v22, %v613_v23 }
  0xaa   : > { %v372_v25 = vrot.slane %v365_v24, %v946_v11 }
  0xac   : > { %v379_v26 = vrot.slane %v372_v25, %v946_v11 }
  0xae   : > { %v381_v2 = vsel %vm951_vm3, %v379_v26, 2.0 }
  0xaf   : > { %525 = vst.msk [vmem:[%s219_s19 + $0x1] ss:$2 sm:$0x3] %vm354_vm6, %v381_v2 }
  0xb0   : > { %687 = shalt.err (!%p684_p2)
}
  0xb1   : > { %s688_s15 = scalar_lea.hbm %s975_s28, 64  ;;  %s692_s6 = scalar_lea.hbm %s1026_s2, 128 }
  0xb2   : > { %p689_p9 = scmp.ne.s32.totalorder %s975_s28, %s688_s15  ;;  %p693_p6 = scmp.lt.u32.totalorder %s975_s28, %s1026_s2 }
  0xb3   : > { %p694_p13 = scmp.lt.u32.totalorder %s692_s6, %s688_s15  ;;  %p696_p8 = scmp.lt.u32.totalorder %s688_s15, %s975_s28 }
  0xb4   : > { %p690_p11 = pnand %p689_p9, %p1041_p0 }
  0xb5   : > { %p695_p5 = por %p694_p13, %p693_p6 }
  0xb6   : > { %p691_p3 = pneg %p690_p11 }
  0xb7   : > { %p697_p7 = por %p696_p8, %p695_p5 }
  0xb9   : > { %p698_p4 = pnand %p697_p7, %p691_p3 }
  0xbb   : > { %701 = shalt.err (!%p698_p4)
}
  0xbc   : > { %538 = dma.vmem_to_hbm [thread:$0]  (%p1041_p0), %s970_s30, 64, %s975_s28, %s385_s25  }
  0xbd PF: > { %s413_s16 = sand.u32 1, %s740_s9   ;;  %p1042_p10 = scmp.ne.s32.totalorder %s1032_s24, 0 }
  0xbe   : > { %p1043_p12 = scmp.ge.s32.totalorder %s760_s14, 2  ;;  %s414_s21 = scalar_lea.sflag [#allocation4], %s413_s16 }
  0xc0   : > { %p548_p1 = pnand %p1043_p12, %p1042_p10 }
  0xc2   : > { %735 = dma.done.wait (!%p548_p1), %s414_s21, 64  }
  0xc3   : > { %737 = vsyncadd (!%p548_p1), %s414_s21, 4294967232  ;;  %s21_s14 = sadd.s32 1, %s760_s14   ;;  %s1044_s9 = smov %s744_s10 }
  0xc4   : > { %p18_p2 = scmp.ge.s32.totalorder %s21_s14, 4   ;;  %s1045_s10 = smov %s748_s11 }
  0xc5   : > { %s1046_s11 = smov %s838_s23  ;;  %s1047_s12 = smov %s756_s13 }
  0xc6   : > { %s1048_s13 = smov %s1050_s17  ;;  %20 = sbr.rel (!%p18_p2) target bundleno = 8 (0x8), region = 87 }
  0xcd   :  { %419 = vsyncpa [#allocation3], 1 }
  0xce   :  { %421 = vsyncpa [#allocation3 + $0x1], 1 }
  0xcf   :  { %422 = vsyncpa [#allocation6], 1 }
  0xd0   :  { %424 = vsyncpa [#allocation6 + $0x1], 1 }
  0xd1   :  { %425 = vsyncpa [#allocation4], 1 }
  0xd2   :  { %427 = vsyncpa [#allocation4 + $0x1], 1 }

</bundles_post_ra>
